<compile_context>
chip_gen: v7x
topology: tpu7x:2x2x1
jax: 0.10.0
libtpu: 0.0.40
codegen_flags: <defaults>
</compile_context>

<pallas_src>
import jax
import jax.numpy as jnp
import numpy as np
from jax.experimental import pallas as pl
from jax.experimental.pallas import tpu as pltpu


# ----------------------------------------------------------------------------
# Fused kernel: in-VMEM perception -> fc1 -> ReLU -> fc2 -> residual -> LN
# ----------------------------------------------------------------------------
def _make_nca_kernel(C, K, H, W, P, P_pad):
    """Builds the fused NCA kernel for static shapes (C=in_channels,
    K=n_classes, P=C+8K perception channels, P_pad=sublane-padded P)."""
    HW = H * W
    offsets = [(r, c) for r in (-1, 0, 1) for c in (-1, 0, 1) if (r, c) != (0, 0)]

    def kernel(x_ref, row_ref, col_ref, w1t_ref, b1_ref, w2t_ref, b2_ref,
               g_ref, bt_ref, o_ref, perc_ref):
        x_img = x_ref[...]            # (C, HW) current state, pixels on lanes
        color = x_img[:K, :]          # first n_classes channels
        row = row_ref[...]            # (1, HW) int32: pixel // W
        col = col_ref[...]            # (1, HW) int32: pixel %  W

        # ---- perception = [state ; 8 zero-padded neighbour shifts] in VMEM ----
        perc_ref[0:C, :] = x_img
        for n, (r, c) in enumerate(offsets):
            conds = []
            if r == -1:
                conds.append(row >= 1)
            elif r == 1:
                conds.append(row < H - 1)
            if c == -1:
                conds.append(col >= 1)
            elif c == 1:
                conds.append(col < W - 1)
            mask = conds[0]
            for extra in conds[1:]:
                mask = jnp.logical_and(mask, extra)
            # out[i*W + j] = color[(i+r)*W + (j+c)], masked to 0 off the grid.
            shifted = pltpu.roll(color, (-(r * W + c)) % HW, 1)
            perc_ref[C + n * K:C + (n + 1) * K, :] = jnp.where(mask, shifted, 0.0)
        if P_pad > P:   # rows matching the zero-padded fc1 weight columns
            perc_ref[P:P_pad, :] = jnp.zeros((P_pad - P, HW), jnp.float32)

        # ---- fc1 -> ReLU -> fc2 -> residual (MXU N dim = HW, K dim = 32) ----
        perc = perc_ref[...]                                        # (P_pad, HW)
        h = jnp.dot(w1t_ref[...], perc,
                    preferred_element_type=jnp.float32,
                    precision=jax.lax.Precision.HIGHEST)            # (Hd, HW)
        h = jnp.maximum(h + b1_ref[...], 0.0)
        dx = jnp.dot(w2t_ref[...], h,
                     preferred_element_type=jnp.float32,
                     precision=jax.lax.Precision.HIGHEST)           # (C, HW)
        new_state = x_img + dx + b2_ref[...]

        # ---- LayerNorm over channels (tiny static C: unrolled VPU adds) ----
        ssum = new_state[0:1, :]
        for i in range(1, C):
            ssum = ssum + new_state[i:i + 1, :]
        mean = ssum * (1.0 / C)
        cent = new_state - mean
        sq = cent * cent
        vsum = sq[0:1, :]
        for i in range(1, C):
            vsum = vsum + sq[i:i + 1, :]
        inv = jax.lax.rsqrt(vsum * (1.0 / C) + 1e-5)                # EUP rsqrt
        o_ref[...] = cent * inv * g_ref[...] + bt_ref[...]

    return kernel


def nca_forward(x_nchw, w1, b1, w2, b2, gamma, beta, n_classes):
    """x_nchw: (B, C, H, W) f32; w1: (P, Hd); b1: (1, Hd); w2: (Hd, C);
    b2 / gamma / beta: (1, C).  Returns (B, C, H, W)."""
    B, C, H, W = x_nchw.shape
    P, Hd = w1.shape
    K = n_classes
    HW = H * W
    P_pad = ((P + 7) // 8) * 8          # sublane-align the fc1 contraction dim

    # Free reshape (no transpose): pixels end up on the lane axis.
    x_flat = x_nchw.reshape(B, C, HW)

    # Transposed / padded parameters for the (channels x pixels) layout.
    w1t = jnp.pad(jnp.transpose(w1), ((0, 0), (0, P_pad - P)))      # (Hd, P_pad)
    b1c = jnp.transpose(b1)                                         # (Hd, 1)
    w2t = jnp.transpose(w2)                                         # (C, Hd)
    b2c = jnp.transpose(b2)                                         # (C, 1)
    gc = jnp.transpose(gamma)                                       # (C, 1)
    bc = jnp.transpose(beta)                                        # (C, 1)

    # Per-pixel row / col indices for the zero-padding masks in the kernel.
    pix = jnp.arange(HW, dtype=jnp.int32)
    row_idx = (pix // W).reshape(1, HW)
    col_idx = (pix % W).reshape(1, HW)

    # Only set an explicit VMEM limit when the whole-image blocks get large.
    vmem_bytes = 4 * (4 * C * HW + P_pad * HW + Hd * HW
                      + Hd * (P_pad + 1) + C * (Hd + 3) + 2 * HW)
    vmem_limit = None
    if vmem_bytes > (20 << 20):
        # TODO(synk): for very large single images (esp. v7x, 64 MiB VMEM),
        # switch to row-tiling with a 1-row halo instead of whole-image blocks.
        vmem_limit = int(min(2 * vmem_bytes, 64 << 20))

    kernel = _make_nca_kernel(C, K, H, W, P, P_pad)
    const = lambda b: (0, 0)
    out_flat = pl.pallas_call(
        kernel,
        out_shape=jax.ShapeDtypeStruct((B, C, HW), jnp.float32),
        grid=(B,),
        in_specs=[
            pl.BlockSpec((None, C, HW), lambda b: (b, 0, 0)),   # state (one image)
            pl.BlockSpec((1, HW), const),                       # row index
            pl.BlockSpec((1, HW), const),                       # col index
            pl.BlockSpec((Hd, P_pad), const),                   # fc1 weight^T (padded)
            pl.BlockSpec((Hd, 1), const),                       # fc1 bias
            pl.BlockSpec((C, Hd), const),                       # fc2 weight^T
            pl.BlockSpec((C, 1), const),                        # fc2 bias
            pl.BlockSpec((C, 1), const),                        # LayerNorm gamma
            pl.BlockSpec((C, 1), const),                        # LayerNorm beta
        ],
        out_specs=pl.BlockSpec((None, C, HW), lambda b: (b, 0, 0)),
        scratch_shapes=[pltpu.VMEM((P_pad, HW), jnp.float32)],  # perception
        compiler_params=pltpu.CompilerParams(
            dimension_semantics=("parallel",),
            vmem_limit_bytes=vmem_limit),
    )(x_flat, row_idx, col_idx, w1t, b1c, w2t, b2c, gc, bc)

    return out_flat.reshape(B, C, H, W)


# ----------------------------------------------------------------------------
# Pure-JAX reference (mirrors the PyTorch forward) for a sanity check.
# ----------------------------------------------------------------------------
def nca_reference(x_nchw, w1, b1, w2, b2, gamma, beta, n_classes):
    B, C, H, W = x_nchw.shape
    x = jnp.transpose(x_nchw, (0, 2, 3, 1))
    color = x[..., :n_classes]
    padded = jnp.pad(color, ((0, 0), (1, 1), (1, 1), (0, 0)))
    neighbors = []
    for r in range(-1, 2):
        for c in range(-1, 2):
            if r == 0 and c == 0:
                continue
            neighbors.append(padded[:, 1 + r:1 + r + H, 1 + c:1 + c + W, :])
    perception = jnp.concatenate([x] + neighbors, axis=-1)
    h = jnp.maximum(jnp.einsum('bhwp,po->bhwo', perception, w1,
                               precision=jax.lax.Precision.HIGHEST) + b1[0], 0.0)
    dx = jnp.einsum('bhwo,oc->bhwc', h, w2,
                    precision=jax.lax.Precision.HIGHEST) + b2[0]
    new_state = x + dx
    mean = jnp.mean(new_state, axis=-1, keepdims=True)
    var = jnp.mean((new_state - mean) ** 2, axis=-1, keepdims=True)
    out = (new_state - mean) / jnp.sqrt(var + 1e-5) * gamma[0] + beta[0]
    return jnp.transpose(out, (0, 3, 1, 2))


if __name__ == "__main__":
    # Shapes consistent with the module: batch=2, in_channels=4, n_classes=3,
    # hidden=32, spatial 16x16  ->  perception channels P = 4 + 8*3 = 28.
    B, C, K, Hd, Hs, Ws = 2, 4, 3, 32, 16, 16
    P = C + 8 * K

    key = jax.random.PRNGKey(0)
    ks = jax.random.split(key, 7)
    x = jax.random.normal(ks[0], (B, C, Hs, Ws), dtype=jnp.float32)

    # Deterministic but NON-zero parameters so every fused stage (perception,
    # fc1, fc2, residual, LayerNorm) is numerically exercised (the module's
    # zero-init of fc2 would make the perception/fc1 path invisible).
    bound = float(np.sqrt(6.0 / (P + Hd)))
    w1 = jax.random.uniform(ks[1], (P, Hd), jnp.float32, -bound, bound)
    b1 = 0.1 * jax.random.normal(ks[2], (1, Hd), jnp.float32)
    w2 = 0.1 * jax.random.normal(ks[3], (Hd, C), jnp.float32)
    b2 = 0.1 * jax.random.normal(ks[4], (1, C), jnp.float32)
    gamma = 1.0 + 0.1 * jax.random.normal(ks[5], (1, C), jnp.float32)
    beta = 0.1 * jax.random.normal(ks[6], (1, C), jnp.float32)

    nca_jit = jax.jit(nca_forward, static_argnums=(7,))
    out = jax.block_until_ready(nca_jit(x, w1, b1, w2, b2, gamma, beta, K))

    ref = jax.block_until_ready(nca_reference(x, w1, b1, w2, b2, gamma, beta, K))
    np.testing.assert_allclose(np.asarray(out), np.asarray(ref),
                               rtol=5e-5, atol=5e-5)
    print("KERNEL_OK")
</pallas_src>

<mosaic_0001>
module attributes {stable_mosaic.version = 11 : i64} {
  func.func @kernel(%arg0: i32, %arg1: memref<1x4x256xf32, #tpu.memory_space<vmem>>, %arg2: memref<1x256xi32, #tpu.memory_space<vmem>>, %arg3: memref<1x256xi32, #tpu.memory_space<vmem>>, %arg4: memref<32x32xf32, #tpu.memory_space<vmem>>, %arg5: memref<32x1xf32, #tpu.memory_space<vmem>>, %arg6: memref<4x32xf32, #tpu.memory_space<vmem>>, %arg7: memref<4x1xf32, #tpu.memory_space<vmem>>, %arg8: memref<4x1xf32, #tpu.memory_space<vmem>>, %arg9: memref<4x1xf32, #tpu.memory_space<vmem>>, %arg10: memref<1x4x256xf32, #tpu.memory_space<vmem>>, %arg11: memref<32x256xf32, #tpu.memory_space<vmem>>) attributes {dimension_semantics = [#tpu.dimension_semantics<parallel>], iteration_bounds = array<i64: 2>, scalar_prefetch = 0 : i64, scratch_operands = 1 : i64, tpu.core_type = #tpu.core_type<tc>, window_params = [{transform_indices = @transform_0, window_bounds = array<i64: 1, 4, 256>}, {pipeline_mode = #tpu.pipeline_mode<synchronous>, transform_indices = @transform_1, window_bounds = array<i64: 1, 256>}, {pipeline_mode = #tpu.pipeline_mode<synchronous>, transform_indices = @transform_2, window_bounds = array<i64: 1, 256>}, {pipeline_mode = #tpu.pipeline_mode<synchronous>, transform_indices = @transform_3, window_bounds = array<i64: 32, 32>}, {pipeline_mode = #tpu.pipeline_mode<synchronous>, transform_indices = @transform_4, window_bounds = array<i64: 32, 1>}, {pipeline_mode = #tpu.pipeline_mode<synchronous>, transform_indices = @transform_5, window_bounds = array<i64: 4, 32>}, {pipeline_mode = #tpu.pipeline_mode<synchronous>, transform_indices = @transform_6, window_bounds = array<i64: 4, 1>}, {pipeline_mode = #tpu.pipeline_mode<synchronous>, transform_indices = @transform_7, window_bounds = array<i64: 4, 1>}, {pipeline_mode = #tpu.pipeline_mode<synchronous>, transform_indices = @transform_8, window_bounds = array<i64: 4, 1>}, {transform_indices = @transform_9, window_bounds = array<i64: 1, 4, 256>}]} {
    %c0 = arith.constant 0 : index
    %c0_0 = arith.constant 0 : index
    %c0_1 = arith.constant 0 : index
    %0 = vector.load %arg1[%c0, %c0_0, %c0_1] : memref<1x4x256xf32, #tpu.memory_space<vmem>>, vector<1x4x256xf32>
    %1 = vector.shape_cast %0 : vector<1x4x256xf32> to vector<4x256xf32>
    %2 = vector.extract_strided_slice %1 {offsets = [0, 0], sizes = [3, 256], strides = [1, 1]} : vector<4x256xf32> to vector<3x256xf32>
    %c0_2 = arith.constant 0 : index
    %c0_3 = arith.constant 0 : index
    %3 = vector.load %arg2[%c0_2, %c0_3] : memref<1x256xi32, #tpu.memory_space<vmem>>, vector<1x256xi32>
    %c0_4 = arith.constant 0 : index
    %c0_5 = arith.constant 0 : index
    %4 = vector.load %arg3[%c0_4, %c0_5] : memref<1x256xi32, #tpu.memory_space<vmem>>, vector<1x256xi32>
    %c0_6 = arith.constant 0 : index
    %c0_7 = arith.constant 0 : index
    %5 = vector.load %arg11[%c0_6, %c0_7] : memref<32x256xf32, #tpu.memory_space<vmem>>, vector<4x256xf32>
    tpu.vector_store %arg11[%c0_6, %c0_7], %1 {strides = array<i32>} : memref<32x256xf32, #tpu.memory_space<vmem>>, vector<4x256xf32>,
    %c1_i32 = arith.constant 1 : i32
    %6 = vector.broadcast %c1_i32 : i32 to vector<1x256xi32>
    %7 = arith.cmpi sge, %3, %6 : vector<1x256xi32>
    %c1_i32_8 = arith.constant 1 : i32
    %8 = vector.broadcast %c1_i32_8 : i32 to vector<1x256xi32>
    %9 = arith.cmpi sge, %4, %8 : vector<1x256xi32>
    %10 = arith.andi %7, %9 : vector<1x256xi1>
    %c17_i32 = arith.constant 17 : i32
    %11 = tpu.dynamic_rotate %2 by %c17_i32 dim 1 : vector<3x256xf32>, i32 -> vector<3x256xf32>
    %cst = arith.constant 0.000000e+00 : f32
    %12 = vector.shape_cast %10 : vector<1x256xi1> to vector<1x256xi1>
    %13 = vector.broadcast %12 : vector<1x256xi1> to vector<3x256xi1>
    %14 = vector.broadcast %cst : f32 to vector<3x256xf32>
    %15 = arith.select %13, %11, %14 : vector<3x256xi1>, vector<3x256xf32>
    %c4 = arith.constant 4 : index
    %c0_9 = arith.constant 0 : index
    %16 = vector.load %arg11[%c4, %c0_9] : memref<32x256xf32, #tpu.memory_space<vmem>>, vector<3x256xf32>
    tpu.vector_store %arg11[%c4, %c0_9], %15 {strides = array<i32>} : memref<32x256xf32, #tpu.memory_space<vmem>>, vector<3x256xf32>,
    %c1_i32_10 = arith.constant 1 : i32
    %17 = vector.broadcast %c1_i32_10 : i32 to vector<1x256xi32>
    %18 = arith.cmpi sge, %3, %17 : vector<1x256xi32>
    %c16_i32 = arith.constant 16 : i32
    %19 = tpu.dynamic_rotate %2 by %c16_i32 dim 1 : vector<3x256xf32>, i32 -> vector<3x256xf32>
    %cst_11 = arith.constant 0.000000e+00 : f32
    %20 = vector.shape_cast %18 : vector<1x256xi1> to vector<1x256xi1>
    %21 = vector.broadcast %20 : vector<1x256xi1> to vector<3x256xi1>
    %22 = vector.broadcast %cst_11 : f32 to vector<3x256xf32>
    %23 = arith.select %21, %19, %22 : vector<3x256xi1>, vector<3x256xf32>
    %c7 = arith.constant 7 : index
    %c0_12 = arith.constant 0 : index
    %24 = vector.load %arg11[%c7, %c0_12] : memref<32x256xf32, #tpu.memory_space<vmem>>, vector<3x256xf32>
    tpu.vector_store %arg11[%c7, %c0_12], %23 {strides = array<i32>} : memref<32x256xf32, #tpu.memory_space<vmem>>, vector<3x256xf32>,
    %c1_i32_13 = arith.constant 1 : i32
    %25 = vector.broadcast %c1_i32_13 : i32 to vector<1x256xi32>
    %26 = arith.cmpi sge, %3, %25 : vector<1x256xi32>
    %c15_i32 = arith.constant 15 : i32
    %27 = vector.broadcast %c15_i32 : i32 to vector<1x256xi32>
    %28 = arith.cmpi slt, %4, %27 : vector<1x256xi32>
    %29 = arith.andi %26, %28 : vector<1x256xi1>
    %c15_i32_14 = arith.constant 15 : i32
    %30 = tpu.dynamic_rotate %2 by %c15_i32_14 dim 1 : vector<3x256xf32>, i32 -> vector<3x256xf32>
    %cst_15 = arith.constant 0.000000e+00 : f32
    %31 = vector.shape_cast %29 : vector<1x256xi1> to vector<1x256xi1>
    %32 = vector.broadcast %31 : vector<1x256xi1> to vector<3x256xi1>
    %33 = vector.broadcast %cst_15 : f32 to vector<3x256xf32>
    %34 = arith.select %32, %30, %33 : vector<3x256xi1>, vector<3x256xf32>
    %c10 = arith.constant 10 : index
    %c0_16 = arith.constant 0 : index
    %35 = vector.load %arg11[%c10, %c0_16] : memref<32x256xf32, #tpu.memory_space<vmem>>, vector<3x256xf32>
    tpu.vector_store %arg11[%c10, %c0_16], %34 {strides = array<i32>} : memref<32x256xf32, #tpu.memory_space<vmem>>, vector<3x256xf32>,
    %c1_i32_17 = arith.constant 1 : i32
    %36 = vector.broadcast %c1_i32_17 : i32 to vector<1x256xi32>
    %37 = arith.cmpi sge, %4, %36 : vector<1x256xi32>
    %c1_i32_18 = arith.constant 1 : i32
    %38 = tpu.dynamic_rotate %2 by %c1_i32_18 dim 1 : vector<3x256xf32>, i32 -> vector<3x256xf32>
    %cst_19 = arith.constant 0.000000e+00 : f32
    %39 = vector.shape_cast %37 : vector<1x256xi1> to vector<1x256xi1>
    %40 = vector.broadcast %39 : vector<1x256xi1> to vector<3x256xi1>
    %41 = vector.broadcast %cst_19 : f32 to vector<3x256xf32>
    %42 = arith.select %40, %38, %41 : vector<3x256xi1>, vector<3x256xf32>
    %c13 = arith.constant 13 : index
    %c0_20 = arith.constant 0 : index
    %43 = vector.load %arg11[%c13, %c0_20] : memref<32x256xf32, #tpu.memory_space<vmem>>, vector<3x256xf32>
    tpu.vector_store %arg11[%c13, %c0_20], %42 {strides = array<i32>} : memref<32x256xf32, #tpu.memory_space<vmem>>, vector<3x256xf32>,
    %c15_i32_21 = arith.constant 15 : i32
    %44 = vector.broadcast %c15_i32_21 : i32 to vector<1x256xi32>
    %45 = arith.cmpi slt, %4, %44 : vector<1x256xi32>
    %c255_i32 = arith.constant 255 : i32
    %46 = tpu.dynamic_rotate %2 by %c255_i32 dim 1 : vector<3x256xf32>, i32 -> vector<3x256xf32>
    %cst_22 = arith.constant 0.000000e+00 : f32
    %47 = vector.shape_cast %45 : vector<1x256xi1> to vector<1x256xi1>
    %48 = vector.broadcast %47 : vector<1x256xi1> to vector<3x256xi1>
    %49 = vector.broadcast %cst_22 : f32 to vector<3x256xf32>
    %50 = arith.select %48, %46, %49 : vector<3x256xi1>, vector<3x256xf32>
    %c16 = arith.constant 16 : index
    %c0_23 = arith.constant 0 : index
    %51 = vector.load %arg11[%c16, %c0_23] : memref<32x256xf32, #tpu.memory_space<vmem>>, vector<3x256xf32>
    tpu.vector_store %arg11[%c16, %c0_23], %50 {strides = array<i32>} : memref<32x256xf32, #tpu.memory_space<vmem>>, vector<3x256xf32>,
    %c15_i32_24 = arith.constant 15 : i32
    %52 = vector.broadcast %c15_i32_24 : i32 to vector<1x256xi32>
    %53 = arith.cmpi slt, %3, %52 : vector<1x256xi32>
    %c1_i32_25 = arith.constant 1 : i32
    %54 = vector.broadcast %c1_i32_25 : i32 to vector<1x256xi32>
    %55 = arith.cmpi sge, %4, %54 : vector<1x256xi32>
    %56 = arith.andi %53, %55 : vector<1x256xi1>
    %c241_i32 = arith.constant 241 : i32
    %57 = tpu.dynamic_rotate %2 by %c241_i32 dim 1 : vector<3x256xf32>, i32 -> vector<3x256xf32>
    %cst_26 = arith.constant 0.000000e+00 : f32
    %58 = vector.shape_cast %56 : vector<1x256xi1> to vector<1x256xi1>
    %59 = vector.broadcast %58 : vector<1x256xi1> to vector<3x256xi1>
    %60 = vector.broadcast %cst_26 : f32 to vector<3x256xf32>
    %61 = arith.select %59, %57, %60 : vector<3x256xi1>, vector<3x256xf32>
    %c19 = arith.constant 19 : index
    %c0_27 = arith.constant 0 : index
    %62 = vector.load %arg11[%c19, %c0_27] : memref<32x256xf32, #tpu.memory_space<vmem>>, vector<3x256xf32>
    tpu.vector_store %arg11[%c19, %c0_27], %61 {strides = array<i32>} : memref<32x256xf32, #tpu.memory_space<vmem>>, vector<3x256xf32>,
    %c15_i32_28 = arith.constant 15 : i32
    %63 = vector.broadcast %c15_i32_28 : i32 to vector<1x256xi32>
    %64 = arith.cmpi slt, %3, %63 : vector<1x256xi32>
    %c240_i32 = arith.constant 240 : i32
    %65 = tpu.dynamic_rotate %2 by %c240_i32 dim 1 : vector<3x256xf32>, i32 -> vector<3x256xf32>
    %cst_29 = arith.constant 0.000000e+00 : f32
    %66 = vector.shape_cast %64 : vector<1x256xi1> to vector<1x256xi1>
    %67 = vector.broadcast %66 : vector<1x256xi1> to vector<3x256xi1>
    %68 = vector.broadcast %cst_29 : f32 to vector<3x256xf32>
    %69 = arith.select %67, %65, %68 : vector<3x256xi1>, vector<3x256xf32>
    %c22 = arith.constant 22 : index
    %c0_30 = arith.constant 0 : index
    %70 = vector.load %arg11[%c22, %c0_30] : memref<32x256xf32, #tpu.memory_space<vmem>>, vector<3x256xf32>
    tpu.vector_store %arg11[%c22, %c0_30], %69 {strides = array<i32>} : memref<32x256xf32, #tpu.memory_space<vmem>>, vector<3x256xf32>,
    %c15_i32_31 = arith.constant 15 : i32
    %71 = vector.broadcast %c15_i32_31 : i32 to vector<1x256xi32>
    %72 = arith.cmpi slt, %3, %71 : vector<1x256xi32>
    %c15_i32_32 = arith.constant 15 : i32
    %73 = vector.broadcast %c15_i32_32 : i32 to vector<1x256xi32>
    %74 = arith.cmpi slt, %4, %73 : vector<1x256xi32>
    %75 = arith.andi %72, %74 : vector<1x256xi1>
    %c239_i32 = arith.constant 239 : i32
    %76 = tpu.dynamic_rotate %2 by %c239_i32 dim 1 : vector<3x256xf32>, i32 -> vector<3x256xf32>
    %cst_33 = arith.constant 0.000000e+00 : f32
    %77 = vector.shape_cast %75 : vector<1x256xi1> to vector<1x256xi1>
    %78 = vector.broadcast %77 : vector<1x256xi1> to vector<3x256xi1>
    %79 = vector.broadcast %cst_33 : f32 to vector<3x256xf32>
    %80 = arith.select %78, %76, %79 : vector<3x256xi1>, vector<3x256xf32>
    %c25 = arith.constant 25 : index
    %c0_34 = arith.constant 0 : index
    %81 = vector.load %arg11[%c25, %c0_34] : memref<32x256xf32, #tpu.memory_space<vmem>>, vector<3x256xf32>
    tpu.vector_store %arg11[%c25, %c0_34], %80 {strides = array<i32>} : memref<32x256xf32, #tpu.memory_space<vmem>>, vector<3x256xf32>,
    %cst_35 = arith.constant 0.000000e+00 : f32
    %82 = vector.broadcast %cst_35 : f32 to vector<4x256xf32>
    %c28 = arith.constant 28 : index
    %c0_36 = arith.constant 0 : index
    %83 = vector.load %arg11[%c28, %c0_36] : memref<32x256xf32, #tpu.memory_space<vmem>>, vector<4x256xf32>
    tpu.vector_store %arg11[%c28, %c0_36], %82 {strides = array<i32>} : memref<32x256xf32, #tpu.memory_space<vmem>>, vector<4x256xf32>,
    %c0_37 = arith.constant 0 : index
    %c0_38 = arith.constant 0 : index
    %84 = vector.load %arg11[%c0_37, %c0_38] : memref<32x256xf32, #tpu.memory_space<vmem>>, vector<32x256xf32>
    %c0_39 = arith.constant 0 : index
    %c0_40 = arith.constant 0 : index
    %85 = vector.load %arg4[%c0_39, %c0_40] : memref<32x32xf32, #tpu.memory_space<vmem>>, vector<32x32xf32>
    %cst_41 = arith.constant dense<0.000000e+00> : vector<32x256xf32>
    %86 = tpu.matmul %85, %84, %cst_41 {dimension_numbers = #tpu.dot_dimension_numbers<[1], [0], [0], [1], [0, 0, 1, 1], [], []>, precision = #tpu.contract_precision<fp32>} : vector<32x32xf32>, vector<32x256xf32>, vector<32x256xf32> -> vector<32x256xf32>
    %c0_42 = arith.constant 0 : index
    %c0_43 = arith.constant 0 : index
    %87 = vector.load %arg5[%c0_42, %c0_43] : memref<32x1xf32, #tpu.memory_space<vmem>>, vector<32x1xf32>
    %88 = vector.broadcast %87 : vector<32x1xf32> to vector<32x256xf32>
    %89 = arith.addf %86, %88 : vector<32x256xf32>
    %cst_44 = arith.constant 0.000000e+00 : f32
    %90 = vector.broadcast %cst_44 : f32 to vector<32x256xf32>
    %91 = arith.maximumf %89, %90 : vector<32x256xf32>
    %c0_45 = arith.constant 0 : index
    %c0_46 = arith.constant 0 : index
    %92 = vector.load %arg6[%c0_45, %c0_46] : memref<4x32xf32, #tpu.memory_space<vmem>>, vector<4x32xf32>
    %cst_47 = arith.constant dense<0.000000e+00> : vector<4x256xf32>
    %93 = tpu.matmul %92, %91, %cst_47 {dimension_numbers = #tpu.dot_dimension_numbers<[1], [0], [0], [1], [0, 0, 1, 1], [], []>, precision = #tpu.contract_precision<fp32>} : vector<4x32xf32>, vector<32x256xf32>, vector<4x256xf32> -> vector<4x256xf32>
    %94 = arith.addf %1, %93 : vector<4x256xf32>
    %c0_48 = arith.constant 0 : index
    %c0_49 = arith.constant 0 : index
    %95 = vector.load %arg7[%c0_48, %c0_49] : memref<4x1xf32, #tpu.memory_space<vmem>>, vector<4x1xf32>
    %96 = vector.broadcast %95 : vector<4x1xf32> to vector<4x256xf32>
    %97 = arith.addf %94, %96 : vector<4x256xf32>
    %98 = vector.extract_strided_slice %97 {offsets = [0, 0], sizes = [1, 256], strides = [1, 1]} : vector<4x256xf32> to vector<1x256xf32>
    %99 = vector.extract_strided_slice %97 {offsets = [1, 0], sizes = [1, 256], strides = [1, 1]} : vector<4x256xf32> to vector<1x256xf32>
    %100 = arith.addf %98, %99 : vector<1x256xf32>
    %101 = vector.extract_strided_slice %97 {offsets = [2, 0], sizes = [1, 256], strides = [1, 1]} : vector<4x256xf32> to vector<1x256xf32>
    %102 = arith.addf %100, %101 : vector<1x256xf32>
    %103 = vector.extract_strided_slice %97 {offsets = [3, 0], sizes = [1, 256], strides = [1, 1]} : vector<4x256xf32> to vector<1x256xf32>
    %104 = arith.addf %102, %103 : vector<1x256xf32>
    %cst_50 = arith.constant 2.500000e-01 : f32
    %105 = vector.broadcast %cst_50 : f32 to vector<1x256xf32>
    %106 = arith.mulf %104, %105 : vector<1x256xf32>
    %107 = vector.broadcast %106 : vector<1x256xf32> to vector<4x256xf32>
    %108 = arith.subf %97, %107 : vector<4x256xf32>
    %109 = arith.mulf %108, %108 : vector<4x256xf32>
    %110 = vector.extract_strided_slice %109 {offsets = [0, 0], sizes = [1, 256], strides = [1, 1]} : vector<4x256xf32> to vector<1x256xf32>
    %111 = vector.extract_strided_slice %109 {offsets = [1, 0], sizes = [1, 256], strides = [1, 1]} : vector<4x256xf32> to vector<1x256xf32>
    %112 = arith.addf %110, %111 : vector<1x256xf32>
    %113 = vector.extract_strided_slice %109 {offsets = [2, 0], sizes = [1, 256], strides = [1, 1]} : vector<4x256xf32> to vector<1x256xf32>
    %114 = arith.addf %112, %113 : vector<1x256xf32>
    %115 = vector.extract_strided_slice %109 {offsets = [3, 0], sizes = [1, 256], strides = [1, 1]} : vector<4x256xf32> to vector<1x256xf32>
    %116 = arith.addf %114, %115 : vector<1x256xf32>
    %cst_51 = arith.constant 2.500000e-01 : f32
    %117 = vector.broadcast %cst_51 : f32 to vector<1x256xf32>
    %118 = arith.mulf %116, %117 : vector<1x256xf32>
    %cst_52 = arith.constant 9.99999974E-6 : f32
    %119 = vector.broadcast %cst_52 : f32 to vector<1x256xf32>
    %120 = arith.addf %118, %119 : vector<1x256xf32>
    %121 = math.rsqrt %120 : vector<1x256xf32>
    %122 = vector.broadcast %121 : vector<1x256xf32> to vector<4x256xf32>
    %123 = arith.mulf %108, %122 : vector<4x256xf32>
    %c0_53 = arith.constant 0 : index
    %c0_54 = arith.constant 0 : index
    %124 = vector.load %arg8[%c0_53, %c0_54] : memref<4x1xf32, #tpu.memory_space<vmem>>, vector<4x1xf32>
    %125 = vector.broadcast %124 : vector<4x1xf32> to vector<4x256xf32>
    %126 = arith.mulf %123, %125 : vector<4x256xf32>
    %c0_55 = arith.constant 0 : index
    %c0_56 = arith.constant 0 : index
    %127 = vector.load %arg9[%c0_55, %c0_56] : memref<4x1xf32, #tpu.memory_space<vmem>>, vector<4x1xf32>
    %128 = vector.broadcast %127 : vector<4x1xf32> to vector<4x256xf32>
    %129 = arith.addf %126, %128 : vector<4x256xf32>
    %c0_57 = arith.constant 0 : index
    %c0_58 = arith.constant 0 : index
    %c0_59 = arith.constant 0 : index
    %130 = vector.load %arg10[%c0_57, %c0_58, %c0_59] : memref<1x4x256xf32, #tpu.memory_space<vmem>>, vector<1x4x256xf32>
    %131 = vector.shape_cast %130 : vector<1x4x256xf32> to vector<4x256xf32>
    %132 = vector.shape_cast %129 : vector<4x256xf32> to vector<1x4x256xf32>
    tpu.vector_store %arg10[%c0_57, %c0_58, %c0_59], %132 {strides = array<i32>} : memref<1x4x256xf32, #tpu.memory_space<vmem>>, vector<1x4x256xf32>,
    return
  }
  func.func @transform_0(%arg0: i32) -> (i32, i32, i32) {
    %c0_i32 = arith.constant 0 : i32
    %c0_i32_0 = arith.constant 0 : i32
    %c0_i32_1 = arith.constant 0 : i32
    return %arg0, %c0_i32, %c0_i32_0 : i32, i32, i32
  }
  func.func @transform_1(%arg0: i32) -> (i32, i32) {
    %c0_i32 = arith.constant 0 : i32
    %c0_i32_0 = arith.constant 0 : i32
    %c0_i32_1 = arith.constant 0 : i32
    return %c0_i32, %c0_i32_0 : i32, i32
  }
  func.func @transform_2(%arg0: i32) -> (i32, i32) {
    %c0_i32 = arith.constant 0 : i32
    %c0_i32_0 = arith.constant 0 : i32
    %c0_i32_1 = arith.constant 0 : i32
    return %c0_i32, %c0_i32_0 : i32, i32
  }
  func.func @transform_3(%arg0: i32) -> (i32, i32) {
    %c0_i32 = arith.constant 0 : i32
    %c0_i32_0 = arith.constant 0 : i32
    %c0_i32_1 = arith.constant 0 : i32
    return %c0_i32, %c0_i32_0 : i32, i32
  }
  func.func @transform_4(%arg0: i32) -> (i32, i32) {
    %c0_i32 = arith.constant 0 : i32
    %c0_i32_0 = arith.constant 0 : i32
    %c0_i32_1 = arith.constant 0 : i32
    return %c0_i32, %c0_i32_0 : i32, i32
  }
  func.func @transform_5(%arg0: i32) -> (i32, i32) {
    %c0_i32 = arith.constant 0 : i32
    %c0_i32_0 = arith.constant 0 : i32
    %c0_i32_1 = arith.constant 0 : i32
    return %c0_i32, %c0_i32_0 : i32, i32
  }
  func.func @transform_6(%arg0: i32) -> (i32, i32) {
    %c0_i32 = arith.constant 0 : i32
    %c0_i32_0 = arith.constant 0 : i32
    %c0_i32_1 = arith.constant 0 : i32
    return %c0_i32, %c0_i32_0 : i32, i32
  }
  func.func @transform_7(%arg0: i32) -> (i32, i32) {
    %c0_i32 = arith.constant 0 : i32
    %c0_i32_0 = arith.constant 0 : i32
    %c0_i32_1 = arith.constant 0 : i32
    return %c0_i32, %c0_i32_0 : i32, i32
  }
  func.func @transform_8(%arg0: i32) -> (i32, i32) {
    %c0_i32 = arith.constant 0 : i32
    %c0_i32_0 = arith.constant 0 : i32
    %c0_i32_1 = arith.constant 0 : i32
    return %c0_i32, %c0_i32_0 : i32, i32
  }
  func.func @transform_9(%arg0: i32) -> (i32, i32, i32) {
    %c0_i32 = arith.constant 0 : i32
    %c0_i32_0 = arith.constant 0 : i32
    %c0_i32_1 = arith.constant 0 : i32
    return %arg0, %c0_i32, %c0_i32_0 : i32, i32, i32
  }
}

</mosaic_0001>

<bundles_post_ra>
// kernel: nca_forward.1
= control target key start
LH: loop header
LB: loop body
LE: loop exit
PB: predicated region body
PF: predicated region fallthrough
CT: control target
= control target key end

     0   :  { %s2321_s30 = smov 0   ;;  %s2852_s0 = inlined_call_operand.vmem [shape: f32[2,4,256], index: 0, kind: input, shape index: {}]   ;;  %s2853_s1 = inlined_call_operand.vmem [shape: s32[1,256], index: 1, kind: input, shape index: {}]   ;;  %s2854_s2 = inlined_call_operand.vmem [shape: s32[1,256], index: 2, kind: input, shape index: {}]   ;;  %s2855_s3 = inlined_call_operand.vmem [shape: f32[32,32], index: 3, kind: input, shape index: {}]   ;;  %s2856_s4 = inlined_call_operand.vmem [shape: f32[32,1], index: 4, kind: input, shape index: {}]   ;;  %s2857_s5 = inlined_call_operand.vmem [shape: f32[4,32], index: 5, kind: input, shape index: {}]   ;;  %s2858_s6 = inlined_call_operand.vmem [shape: f32[4,1], index: 6, kind: input, shape index: {}]   ;;  %s2859_s7 = inlined_call_operand.vmem [shape: f32[4,1], index: 7, kind: input, shape index: {}]   ;;  %s2860_s8 = inlined_call_operand.vmem [shape: f32[4,1], index: 8, kind: input, shape index: {}]   ;;  %s2861_s9 = inlined_call_operand.vmem [shape: f32[2,4,256], index: 9, kind: output, shape index: {}]  }
   0x1 LB: > { %s2051_s10 = sadd.s32 4294967295, %s2258_s30   ;;  %p2055_p0 = scmp.ge.s32.totalorder %s2258_s30, 1  ;;  %s2258_s30 = sphi %s2321_s30, %s19_s30  }
   0x2   : > { %p287_p1 = scmp.lt.s32.totalorder %s2258_s30, 3 }
   0x4   : > { %p288_p2 = pnand %p2055_p0, %p287_p1 }
   0x5   : > { %p323_p3 = scmp.lt.s32.totalorder (!%p288_p2), %s2051_s10, 1  ;;  %v2260_v0 = vmov (!%p288_p2), 0   ;;  %s2261_s15 = smov (!%p288_p2), 16   ;;  %v2266_v3 = vmov (!%p288_p2), 0.0   ;;  %v348_v4 = vlaneseq (!%p288_p2)  ;;  %v2359_v5 = vld [vmem:[%s2854_s2] sm:$0x3] (!%p288_p2) }
   0x6   : > { %291 = sbr.rel (%p288_p2) target bundleno = 794 (0x31a), region = 56  ;;  %2247 = vset.pattern.permute.xlu0 (!%p288_p2), %v2260_v0  ;;  %2248 = vset.pattern.permute.xlu1 (!%p288_p2), %v2260_v0  ;;  %s2262_s16 = smov (!%p288_p2), 17   ;;  %574 = vst [vmem:[#allocation2 + $0x38] sm:$0xf0] (!%p288_p2), %v2266_v3  ;;  %573 = vst [vmem:[#allocation2 + $0x30] sm:$0xf0] (!%p288_p2), %v2266_v3 }
   0x7   : > { %s2263_s17 = smov (!%p288_p2), 15   ;;  %s2264_s18 = smov (!%p288_p2), 1   ;;  %696 = vmatprep.mubr.f32.mxu1 (!%p288_p2), %v2266_v3  ;;  %845 = vmatprep.mubr.f32.mxu0 (!%p288_p2), %v2266_v3  ;;  %v2364_v6 = vld [vmem:[%s2853_s1] sm:$0x3] (!%p288_p2)  ;;  %v2366_v7 = vshrl.u32 (!%p288_p2), %v348_v4, 7  ;;  %vm404_vm0 = vcmp.lt.s32.totalorder (!%p288_p2), %v2359_v5, 15 }
   0x8   : > { %s2265_s19 = smov (!%p288_p2), 113   ;;  %s2267_s20 = smov (!%p288_p2), 112   ;;  %vm341_vm1 = vcmp.ge.s32.totalorder (!%p288_p2), %v2364_v6, 1  ;;  %vm342_vm2 = vcmp.ge.s32.totalorder (!%p288_p2), %v2359_v5, 1  ;;  %v587_v10 = vld [vmem:[%s2856_s4] sm:$0xff] (!%p288_p2)  ;;  %v588_v11 = vld [vmem:[%s2856_s4 + $0x8] sm:$0xff] (!%p288_p2) }
   0x9   : > { %s2268_s21 = smov (!%p288_p2), 111   ;;  %s2269_s22 = smov (!%p288_p2), 127   ;;  %v2372_v8 = vsub.s32 (!%p288_p2), 0, %v2366_v7  ;;  %v2375_v9 = vsub.s32 (!%p288_p2), 1, %v2366_v7  ;;  %vm405_vm3 = vmand (!%p288_p2), %vm341_vm1, %vm404_vm0  ;;  %v381_v12 = vsel (!%p288_p2), %vm341_vm1, 1, %v2260_v0  ;;  %v589_v13 = vld [vmem:[%s2856_s4 + $0x10] sm:$0xff] (!%p288_p2) }
   0xa   : > { %vm343_vm4 = vmand (!%p288_p2), %vm341_vm1, %vm342_vm2  ;;  %v590_v14 = vld [vmem:[%s2856_s4 + $0x18] sm:$0xff] (!%p288_p2)  ;;  %v2394_v15 = vand.u32 (!%p288_p2), 127, %v348_v4  ;;  %v413_v16 = vsel (!%p288_p2), %vm405_vm3, 1, %v2260_v0  ;;  %vm484_vm5 = vcmp.lt.s32.totalorder (!%p288_p2), %v2364_v6, 15  ;;  %v441_v22 = vsel (!%p288_p2), %vm342_vm2, 1, %v2260_v0  ;;  %v583_v30 = vld [vmem:[%s2855_s3] sm:$0xff] (!%p288_p2) }
   0xb   : > { %v385_v17 = vrot.slane (!%p288_p2), %v381_v12, %v2372_v8  ;;  %v389_v18 = vrot.slane (!%p288_p2), %v381_v12, %v2375_v9  ;;  %v353_v19 = vsel (!%p288_p2), %vm343_vm4, 1, %v2260_v0  ;;  %v417_v23 = vrot.slane (!%p288_p2), %v413_v16, %v2372_v8  ;;  %v1874_v24 = vld [vmem:[%s2858_s6] sm:$0xf] (!%p288_p2)  ;;  %vm2418_vm7 = vmand (!%p288_p2), %vm484_vm5, %vm342_vm2 }
   0xc   : > { %v1967_v25 = vld [vmem:[%s2859_s7] sm:$0xf] (!%p288_p2)  ;;  %vm378_vm6 = vcmp.lt.s32.totalorder (!%p288_p2), %v2394_v15, 16  ;;  %v421_v26 = vrot.slane (!%p288_p2), %v413_v16, %v2375_v9  ;;  %v357_v27 = vrot.slane (!%p288_p2), %v353_v19, %v2372_v8  ;;  %v361_v31 = vrot.slane (!%p288_p2), %v353_v19, %v2375_v9  ;;  %vm2499_vm4 = vmand (!%p288_p2), %vm484_vm5, %vm404_vm0 }
   0xd   : > { %s2899_s10 = smov (!%p323_p3, %s2051_s10), 1  ;;  %vm2422_vm8 = vcmp.eq.s32.totalorder %v385_v17, 1  ;;  %vm2426_vm9 = vcmp.eq.s32.totalorder %v389_v18, 1  ;;  %v445_v32 = vrot.slane %v441_v22, %v2372_v8  ;;  %vm410_vm10 = vcmp.lt.s32.totalorder %v2394_v15, 15  ;;  %v1981_v40 = vld [vmem:[%s2860_s8] sm:$0xf] }
   0xe   : > { %s2068_s11 = sshll.u32 %s2899_s10, 3  ;;  %vm350_vm11 = vcmp.lt.s32.totalorder %v2394_v15, 17  ;;  %vm438_vm12 = vcmp.lt.s32.totalorder %v2394_v15, 1  ;;  %v449_v35 = vrot.slane %v441_v22, %v2375_v9  ;;  %vm2440_vm13 = vcmp.eq.s32.totalorder %v417_v23, 1 }
   0xf   : > { %s327_s14 = scalar_lea.vmem %s2852_s0, %s2068_s11  ;;  %v493_v39 = vsel %vm2418_vm7, 1, %v2260_v0  ;;  %vm2454_vm14 = vcmp.eq.s32.totalorder %v421_v26, 1  ;;  %vm2458_vm15 = vcmp.eq.s32.totalorder %v357_v27, 1  ;;  %vm2462_vm1 = vcmp.eq.s32.totalorder %v361_v31, 1 }
  0x10   : > { %v2339_v1 = vld [vmem:[%s327_s14] sm:$0xff]  ;;  %vm2466_vm2 = vcmp.eq.s32.totalorder %v445_v32, 1  ;;  %vm2470_vm3 = vcmp.eq.s32.totalorder %v449_v35, 1  ;;  %v497_v52 = vrot.slane %v493_v39, %v2372_v8  ;;  %v501_v53 = vrot.slane %v493_v39, %v2375_v9 }
  0x11   : > { %374 = vrot.lane.b32.xlu1 %v2339_v1, %s2261_s15  ;;  %339 = vst [vmem:[#allocation2] sm:$0xf] %v2339_v1  ;;  %344 = vrot.lane.b32.xlu0 %v2339_v1, %s2262_s16  ;;  %v337_v2 = vcombine.high %v2339_v1, %v2339_v1  ;;  %v521_v54 = vsel %vm484_vm5, 1, %v2260_v0  ;;  %v469_v29 = vsel %vm404_vm0, 1, %v2260_v0 }
  0x12   : > { %v525_v17 = vrot.slane %v521_v54, %v2372_v8  ;;  %vm2513_vm5 = vcmp.eq.s32.totalorder %v497_v52, 1  ;;  %vm2518_vm7 = vcmp.eq.s32.totalorder %v501_v53, 1  ;;  %v473_v39 = vrot.slane %v469_v29, %v2372_v8 }
  0x13   : > { %340 = vst [vmem:[#allocation2 + $0x8] sm:$0xf] %v337_v2 }
  0x15   : > { %406 = vrot.lane.b32.xlu0 %v2339_v1, %s2263_s17  ;;  %376 = vrot.lane.b32.xlu1 %v337_v2, %s2261_s15 }
  0x19   : > { %408 = vrot.lane.b32.xlu1 %v337_v2, %s2263_s17  ;;  %346 = vrot.lane.b32.xlu0 %v337_v2, %s2262_s16  ;;  %s332_s17 = scalar_lea.vmem %s2861_s9, %s2068_s11 }
  0x1d   : > { %436 = vrot.lane.b32.xlu1 %v337_v2, %s2264_s18  ;;  %434 = vrot.lane.b32.xlu0 %v2339_v1, %s2264_s18 }
  0x21   : > { %488 = vrot.lane.b32.xlu1 %v337_v2, %s2265_s19  ;;  %486 = vrot.lane.b32.xlu0 %v2339_v1, %s2265_s19 }
  0x25   : > { %516 = vrot.lane.b32.xlu1 %v337_v2, %s2267_s20  ;;  %514 = vrot.lane.b32.xlu0 %v2339_v1, %s2267_s20 }
  0x29   : > { %547 = vrot.lane.b32.xlu1 %v337_v2, %s2268_s21  ;;  %545 = vrot.lane.b32.xlu0 %v2339_v1, %s2268_s21 }
  0x2d   : > { %464 = vrot.lane.b32.xlu1 %v337_v2, %s2269_s22  ;;  %462 = vrot.lane.b32.xlu0 %v2339_v1, %s2269_s22 }
  0x31   : > { %593 = vperm.xlu0 %2247, %v587_v10   ;;  %598 = vperm.xlu1 %2248, %v588_v11  }
  0x35   : > { %603 = vperm.xlu1 %2248, %v589_v13   ;;  %608 = vperm.xlu0 %2247, %v590_v14  }
  0x39   : > { %1877 = vperm.xlu1 %2248, %v1874_v24   ;;  %1970 = vperm.xlu0 %2247, %v1967_v25   ;;  %v552_v24 = vsel %vm2499_vm4, 1, %v2260_v0 }
  0x3d   : > { %1984 = vperm.xlu1 %2248, %v1981_v40   ;;  %v477_v40 = vrot.slane %v469_v29, %v2375_v9 }
  0x83   : > { %v375_v20 = vpop.permute.xlu1 %374  ;;  %v345_v21 = vpop.permute.xlu0 %344 }
  0x87   : > { %v407_v33 = vpop.permute.xlu0 %406  ;;  %v377_v34 = vpop.permute.xlu1 %376 }
  0x88   : > { %v379_v36 = vsel %vm378_vm6, %v375_v20, %v377_v34  ;;  %v380_v37 = vsel %vm378_vm6, %v377_v34, %v375_v20  ;;  %vm490_vm6 = vcmp.lt.s32.totalorder %v2394_v15, 113  ;;  %v529_v20 = vrot.slane %v521_v54, %v2375_v9 }
  0x89   : > { %v392_v41 = vsel %vm2422_vm8, %v380_v37, 0.0  ;;  %v393_v42 = vsel %vm2426_vm9, %v379_v36, 0.0  ;;  %vm518_vm8 = vcmp.lt.s32.totalorder %v2394_v15, 112  ;;  %vm611_vm9 = vcmask 261120  }
  0x8a   : > { %v396_v45 = vrot.slane %v392_v41, 1  ;;  %v397_v46 = vrot.slane %v393_v42, 1  ;;  %v560_v34 = vrot.slane %v552_v24, %v2375_v9  ;;  %vm2546_vm0 = vcmp.eq.s32.totalorder %v529_v20, 1 }
  0x8b   : > { %v409_v49 = vpop.permute.xlu1 %408  ;;  %v347_v50 = vpop.permute.xlu0 %346  ;;  %v613_v43 = vsel %vm611_vm9, %v583_v30, 0 }
  0x8c   : > { %400 = vst [vmem:[#allocation2 + $0x10] ss:$-12 sps:$4 sm:$0x83] %v396_v45   ;;  %401 = vst [vmem:[#allocation2 + $0x18] ss:$-12 sps:$4 sm:$0x83] %v397_v46   ;;  %v411_v55 = vsel %vm410_vm10, %v407_v33, %v409_v49  ;;  %v412_v56 = vsel %vm410_vm10, %v409_v49, %v407_v33  ;;  %v351_v57 = vsel %vm350_vm11, %v345_v21, %v347_v50 }
  0x8d   : > { %v352_v58 = vsel %vm350_vm11, %v347_v50, %v345_v21  ;;  %v424_v59 = vsel %vm2440_vm13, %v412_v56, 0.0  ;;  %v425_v60 = vsel %vm2454_vm14, %v411_v55, 0.0  ;;  %v365_v62 = vsel %vm2462_vm1, %v351_v57, 0.0 }
  0x8e   : > { %v364_v61 = vsel %vm2458_vm15, %v352_v58, 0.0  ;;  %v428_v63 = vrot.slane %v424_v59, 6  ;;  %v429_v2 = vrot.slane %v425_v60, 6  ;;  %v369_v10 = vrot.slane %v365_v62, 4 }
  0x8f   : > { %v368_v4 = vrot.slane %v364_v61, 4  ;;  %v437_v11 = vpop.permute.xlu1 %436  ;;  %v435_v12 = vpop.permute.xlu0 %434  ;;  %v556_v33 = vrot.slane %v552_v24, %v2372_v8  ;;  %vm2542_vm10 = vcmp.eq.s32.totalorder %v525_v17, 1  ;;  %vm549_vm11 = vcmp.lt.s32.totalorder %v2394_v15, 111 }
  0x90   : > { %432 = vst [vmem:[#allocation2 + $0x10] sm:$0x1c] %v428_v63  ;;  %433 = vst [vmem:[#allocation2 + $0x18] sm:$0x1c] %v429_v2  ;;  %v439_v14 = vsel %vm438_vm12, %v435_v12, %v437_v11  ;;  %v440_v16 = vsel %vm438_vm12, %v437_v11, %v435_v12  ;;  %vm2566_vm13 = vcmp.eq.s32.totalorder %v560_v34, 1  ;;  %vm466_vm14 = vcmp.lt.s32.totalorder %v2394_v15, 127 }
  0x91   : > { %372 = vst [vmem:[#allocation2] sm:$0x70] %v368_v4  ;;  %373 = vst [vmem:[#allocation2 + $0x8] sm:$0x70] %v369_v10  ;;  %v452_v6 = vsel %vm2466_vm2, %v440_v16, 0.0  ;;  %v453_v18 = vsel %vm2470_vm3, %v439_v14, 0.0 }
  0x92   : > { %v456_v21 = vrot.slane %v452_v6, 3  ;;  %v457_v22 = vrot.slane %v453_v18, 3  ;;  %vm2562_vm12 = vcmp.eq.s32.totalorder %v556_v33, 1  ;;  %vm2575_vm15 = vcmp.eq.s32.totalorder %v473_v39, 1 }
  0x93   : > { %v489_v25 = vpop.permute.xlu1 %488  ;;  %v487_v26 = vpop.permute.xlu0 %486  ;;  %vm2579_vm1 = vcmp.eq.s32.totalorder %v477_v40, 1  ;;  %v2583_v61 = vand.u32 4294901760, %v613_v43 }
  0x94   : > { %460 = vst [vmem:[#allocation2 + $0x10] sm:$0xe0] %v456_v21  ;;  %461 = vst [vmem:[#allocation2 + $0x18] sm:$0xe0] %v457_v22  ;;  %v491_v27 = vsel %vm490_vm6, %v487_v26, %v489_v25  ;;  %v492_v28 = vsel %vm490_vm6, %v489_v25, %v487_v26 }
  0x95   : > { %v504_v31 = vsel %vm2513_vm5, %v491_v27, 0.0  ;;  %v505_v32 = vsel %vm2518_vm7, %v492_v28, 0.0  ;;  %v2618_v28 = vsub.f32 %v613_v43, %v2583_v61 }
  0x96   : > { %v508_v35 = vrot.slane %v504_v31, 5  ;;  %v509_v36 = vrot.slane %v505_v32, 5  ;;  %v584_v31 = vld [vmem:[%s2855_s3 + $0x8] sm:$0xff] }
  0x97   : > { %v517_v37 = vpop.permute.xlu1 %516  ;;  %v515_v38 = vpop.permute.xlu0 %514 }
  0x98   : > { %v576_v41 = vld [vmem:[#allocation2 + $0x8] sm:$0xff]  ;;  %v575_v42 = vld [vmem:[#allocation2] sm:$0xff]  ;;  %512 = vst [vmem:[#allocation2 + $0x20] sm:$0x38] %v508_v35  ;;  %513 = vst [vmem:[#allocation2 + $0x28] sm:$0x38] %v509_v36  ;;  %v519_v44 = vsel %vm518_vm8, %v515_v38, %v517_v37  ;;  %v520_v45 = vsel %vm518_vm8, %v517_v37, %v515_v38 }
  0x99   : > { %v624_v46 = vand.u32 4294901760, %v576_v41  ;;  %v626_v47 = vand.u32 4294901760, %v575_v42  ;;  %v532_v48 = vsel %vm2542_vm10, %v519_v44, 0.0  ;;  %v533_v9 = vsel %vm2546_vm0, %v520_v45, 0.0  ;;  %v585_v36 = vld [vmem:[%s2855_s3 + $0x10] sm:$0xff]  ;;  %v586_v45 = vld [vmem:[%s2855_s3 + $0x18] sm:$0xff] }
  0x9a   : > { %v536_v51 = vrot.slane %v532_v48, 2  ;;  %v537_v52 = vrot.slane %v533_v9, 2  ;;  %v699_v35 = vand.u32 4294901760, %v2618_v28  ;;  %v616_v38 = vsel %vm611_vm9, %v584_v31, 0 }
  0x9b   : > { %v2570_v53 = vsub.f32 %v576_v41, %v624_v46  ;;  %v2572_v54 = vsub.f32 %v575_v42, %v626_v47  ;;  %v548_v55 = vpop.permute.xlu1 %547  ;;  %v546_v56 = vpop.permute.xlu0 %545  ;;  %v578_v59 = vld [vmem:[#allocation2 + $0x18] sm:$0xff]  ;;  %v577_v60 = vld [vmem:[#allocation2 + $0x10] sm:$0xff]  ;;  %v619_v44 = vsel %vm611_vm9, %v585_v36, 0  ;;  %v2645_v9 = vand.u32 4294901760, %v616_v38 }
  0x9c   : > { %540 = vst [vmem:[#allocation2 + $0x30] ss:$-12 sps:$4 sm:$0xc1] %v536_v51   ;;  %541 = vst [vmem:[#allocation2 + $0x38] ss:$-12 sps:$4 sm:$0xc1] %v537_v52   ;;  %v550_v62 = vsel %vm549_vm11, %v546_v56, %v548_v55  ;;  %v551_v63 = vsel %vm549_vm11, %v548_v55, %v546_v56  ;;  %v700_v48 = vsub.f32 %v2618_v28, %v699_v35 }
  0x9d   : > { %v628_v2 = vand.u32 4294901760, %v578_v59  ;;  %v630_v4 = vand.u32 4294901760, %v577_v60  ;;  %v563_v10 = vsel %vm2562_vm12, %v550_v62, 0.0  ;;  %v564_v11 = vsel %vm2566_vm13, %v551_v63, 0.0 }
  0x9e   : > { %v743_v12 = vand.u32 4294901760, %v2570_v53  ;;  %v749_v13 = vand.u32 4294901760, %v2572_v54  ;;  %v567_v14 = vrot.slane %v563_v10, 7  ;;  %v568_v16 = vrot.slane %v564_v11, 7 }
  0x9f   : > { %v2595_v17 = vpack.c.bf16 %v628_v2, %v624_v46  ;;  %v2597_v6 = vsub.f32 %v578_v59, %v628_v2  ;;  %v465_v18 = vpop.permute.xlu1 %464  ;;  %v463_v19 = vpop.permute.xlu0 %462  ;;  %v2599_v20 = vpack.c.bf16 %v630_v4, %v626_v47  ;;  %v2601_v21 = vsub.f32 %v577_v60, %v630_v4 }
  0xa0   : > { %571 = vst [vmem:[#allocation2 + $0x30] sm:$0xe] %v567_v14  ;;  %572 = vst [vmem:[#allocation2 + $0x38] sm:$0xe] %v568_v16  ;;  %v467_v22 = vsel %vm466_vm14, %v463_v19, %v465_v18  ;;  %v468_v23 = vsel %vm466_vm14, %v465_v18, %v463_v19  ;;  %v744_v24 = vsub.f32 %v2570_v53, %v743_v12  ;;  %v2654_v56 = vand.u32 4294901760, %v619_v44 }
  0xa1   : > { %2071 = vmatprep.subr.bf16.mxu1 %v2595_v17  ;;  %v755_v25 = vand.u32 4294901760, %v2597_v6  ;;  %v480_v26 = vsel %vm2575_vm15, %v467_v22, 0.0  ;;  %v481_v27 = vsel %vm2579_vm1, %v468_v23, 0.0  ;;  %v750_v29 = vsub.f32 %v2572_v54, %v749_v13 }
  0xa2   : > { %2073 = vmatpush1.bf16.msra.mxu1 %v2599_v20  ;;  %482 = vst [vmem:[#allocation2 + $0x20] sm:$0x7] %v480_v26  ;;  %483 = vst [vmem:[#allocation2 + $0x28] sm:$0x7] %v481_v27  ;;  %v761_v30 = vand.u32 4294901760, %v2601_v21  ;;  %v745_v32 = vand.u32 4294901760, %v744_v24  ;;  %v2652_v55 = vsub.f32 %v616_v38, %v2645_v9  ;;  %v2679_v19 = vsub.f32 %v619_v44, %v2654_v56 }
  0xa3   : > { %v756_v15 = vsub.f32 %v2597_v6, %v755_v25  ;;  %v751_v0 = vand.u32 4294901760, %v750_v29  ;;  %v622_v57 = vsel %vm611_vm9, %v586_v45, 0  ;;  %v701_v4 = vand.u32 4294901760, %v700_v48 }
  0xa4   : > { %v762_v34 = vsub.f32 %v2601_v21, %v761_v30  ;;  %v710_v14 = vand.u32 4294901760, %v2652_v55  ;;  %v2681_v22 = vand.u32 4294901760, %v622_v57  ;;  %v721_v27 = vand.u32 4294901760, %v2679_v19 }
  0xa5   : > { %v757_v33 = vand.u32 4294901760, %v756_v15  ;;  %v2102_v45 = vpack.c.bf16 %v755_v25, %v743_v12 }
  0xa6   : > { %v763_v37 = vand.u32 4294901760, %v762_v34  ;;  %v711_v26 = vsub.f32 %v2652_v55, %v710_v14 }
  0xa7   : > { %v2078_v5 = vpack.c.bf16 %v757_v33, %v745_v32  ;;  %v582_v39 = vld [vmem:[#allocation2 + $0x38] sm:$0xff]  ;;  %v581_v40 = vld [vmem:[#allocation2 + $0x30] sm:$0xff]  ;;  %v2694_v33 = vsub.f32 %v622_v57, %v2681_v22 }
  0xa8   : > { %v2080_v41 = vpack.c.bf16 %v763_v37, %v751_v0  ;;  %v636_v42 = vand.u32 4294901760, %v582_v39  ;;  %v638_v43 = vand.u32 4294901760, %v581_v40  ;;  %v722_v0 = vsub.f32 %v2679_v19, %v721_v27 }
  0xa9   : > { %2079 = vmatprep.subr.bf16.mxu0 %v2078_v5  ;;  %v580_v46 = vld [vmem:[#allocation2 + $0x28] sm:$0xff]  ;;  %v579_v47 = vld [vmem:[#allocation2 + $0x20] sm:$0xff]  ;;  %v2086_v37 = vpack.c.bf16 %v2597_v6, %v2570_v53  ;;  %v732_v38 = vand.u32 4294901760, %v2694_v33  ;;  %v2104_v53 = vpack.c.bf16 %v761_v30, %v749_v13 }
  0xaa   : > { %2081 = vmatpush1.bf16.msra.mxu0 %v2080_v41  ;;  %v632_v49 = vand.u32 4294901760, %v580_v46  ;;  %v2647_v50 = vsub.f32 %v582_v39, %v636_v42  ;;  %v634_v51 = vand.u32 4294901760, %v579_v47  ;;  %v2649_v52 = vsub.f32 %v581_v40, %v638_v43  ;;  %v1322_v30 = vld [vmem:[%s2857_s5] sm:$0xf] }
  0xab   : > { %v723_v39 = vand.u32 4294901760, %v722_v0  ;;  %v733_v40 = vsub.f32 %v2694_v33, %v732_v38 }
  0xac   : > { %v2657_v58 = vpack.c.bf16 %v636_v42, %v632_v49  ;;  %v2659_v59 = vsub.f32 %v580_v46, %v632_v49  ;;  %v2661_v60 = vpack.c.bf16 %v638_v43, %v634_v51  ;;  %v2663_v62 = vsub.f32 %v579_v47, %v634_v51 }
  0xad   : > { %v779_v63 = vand.u32 4294901760, %v2647_v50  ;;  %v785_v2 = vand.u32 4294901760, %v2649_v52  ;;  %v734_v43 = vand.u32 4294901760, %v733_v40 }
  0xae   : > { %2075 = vmatprep.subr.bf16.mxu1 %v2657_v58  ;;  %v767_v10 = vand.u32 4294901760, %v2659_v59  ;;  %v773_v11 = vand.u32 4294901760, %v2663_v62  ;;  %v2090_v42 = vpack.c.bf16 %v2647_v50, %v2659_v59  ;;  %v2092_v44 = vpack.c.bf16 %v2649_v52, %v2663_v62 }
  0xaf   : > { %2077 = vmatpush1.bf16.msra.mxu1 %v2661_v60  ;;  %v780_v16 = vsub.f32 %v2647_v50, %v779_v63  ;;  %v786_v18 = vsub.f32 %v2649_v52, %v785_v2 }
  0xb0   : > { %2166 = vmatprep.subr.bf16.mxu1 %v2078_v5  ;;  %v768_v23 = vsub.f32 %v2659_v59, %v767_v10  ;;  %v774_v24 = vsub.f32 %v2663_v62, %v773_v11  ;;  %v712_v5 = vand.u32 4294901760, %v711_v26  ;;  %v2106_v12 = vpack.c.bf16 %v779_v63, %v767_v10  ;;  %v594_v46 = vpop.permute.xlu0 %593  ;;  %v599_v48 = vpop.permute.xlu1 %598 }
  0xb1   : > { %v781_v29 = vand.u32 4294901760, %v780_v16  ;;  %v787_v32 = vand.u32 4294901760, %v786_v18 }
  0xb2   : > { %702 = vmatmul.mubr.f32.vlgmr.msra.gmra.mrb[0].mxu1 %v701_v4  ;;  %v769_v15 = vand.u32 4294901760, %v768_v23  ;;  %v775_v31 = vand.u32 4294901760, %v774_v24 }
  0xb3   : > { %2168 = vmatpush1.bf16.msra.mxu1 %v2080_v41  ;;  %707 = vmatprep.mubr.f32.mxu1 %v2266_v3  ;;  %v2088_v41 = vpack.c.bf16 %v2601_v21, %v2572_v54  ;;  %v2108_v54 = vpack.c.bf16 %v785_v2, %v773_v11 }
  0xb4   : > { %v2082_v34 = vpack.c.bf16 %v781_v29, %v769_v15  ;;  %v2084_v36 = vpack.c.bf16 %v787_v32, %v775_v31  ;;  %v609_v16 = vpop.permute.xlu0 %608 }
  0xb6   : > { %2083 = vmatprep.subr.bf16.mxu0 %v2082_v34  ;;  %2167 = vmatprep.subr.bf16.mxu1 %v2082_v34 }
  0xb7   : > { %2085 = vmatpush1.bf16.msra.mxu0 %v2084_v36  ;;  %2169 = vmatpush1.bf16.msra.mxu1 %v2084_v36 }
  0xb8   : > { %2087 = vmatprep.subr.bf16.mxu0 %v2086_v37  ;;  %713 = vmatmul.mubr.f32.gmra.mrb[2].mxu1 %v712_v5 }
  0xb9   : > { %718 = vmatprep.mubr.f32.mxu1 %v2266_v3 }
  0xba   : > { %847 = vmatmul.mubr.f32.vlgmr.msra.gmra.mrb[0].mxu0 %v2583_v61 }
  0xbb   : > { %2089 = vmatpush1.bf16.msra.mxu0 %v2088_v41  ;;  %852 = vmatprep.mubr.f32.mxu0 %v2266_v3 }
  0xbc   : > { %2091 = vmatprep.subr.bf16.mxu0 %v2090_v42  ;;  %724 = vmatmul.mubr.f32.gmra.mrb[4].mxu1 %v723_v39 }
  0xbd   : > { %729 = vmatprep.mubr.f32.mxu1 %v2266_v3 }
  0xbe   : > { %854 = vmatmul.mubr.f32.gmra.mrb[2].mxu0 %v2645_v9 }
  0xbf   : > { %2093 = vmatpush1.bf16.msra.mxu0 %v2092_v44  ;;  %954 = vmatprep.mubr.f32.mxu0 %v2266_v3 }
  0xc0   : > { %2095 = vmatprep.subr.bf16.mxu0 %v2595_v17  ;;  %735 = vmatmul.mubr.f32.gmra.mrb[6].mxu1 %v734_v43 }
  0xc1   : > { %859 = vmatprep.mubr.f32.mxu1 %v2266_v3 }
  0xc2   : > { %957 = vmatmul.mubr.f32.vlgmr.msra.gmra.mrb[0].mxu0 %v2618_v28 }
  0xc3   : > { %2097 = vmatpush1.bf16.msra.mxu0 %v2599_v20  ;;  %962 = vmatprep.mubr.f32.mxu0 %v2266_v3 }
  0xc4   : > { %2099 = vmatprep.subr.bf16.mxu0 %v2657_v58  ;;  %861 = vmatmul.mubr.f32.vlgmr.msra.gmra.mrb[4].mxu1 %v2654_v56 }
  0xc5   : > { %866 = vmatprep.mubr.f32.mxu1 %v2266_v3 }
  0xc6   : > { %965 = vmatmul.mubr.f32.gmra.mrb[2].mxu0 %v2652_v55 }
  0xc7   : > { %2101 = vmatpush1.bf16.msra.mxu0 %v2661_v60  ;;  %970 = vmatprep.mubr.f32.mxu0 %v2266_v3 }
  0xc8   : > { %2103 = vmatprep.subr.bf16.mxu0 %v2102_v45  ;;  %868 = vmatmul.mubr.f32.gmra.mrb[6].mxu1 %v2681_v22 }
  0xc9   : > { %1398 = vmatprep.mubr.f32.mxu1 %v2266_v3 }
  0xca   : > { %973 = vmatmul.mubr.f32.gmra.mrb[4].mxu0 %v2679_v19 }
  0xcb   : > { %978 = vmatprep.mubr.f32.mxu0 %v2266_v3 }
  0xce   : > { %981 = vmatmul.mubr.f32.gmra.mrb[6].mxu0 %v2694_v33 }
  0xcf   : > { %1059 = vmatprep.mubr.f32.mxu0 %v2266_v3 }
  0xd2   : > { %1063 = vmatmul.mubr.f32.vlgmr.msra.gmra.mrb[0].mxu0 %v699_v35  ;;  %v1324_v35 = vsel %vm611_vm9, %v1322_v30, 0 }
  0xd3   : > { %2105 = vmatpush1.bf16.msra.mxu0 %v2104_v53  ;;  %1068 = vmatprep.mubr.f32.mxu0 %v2266_v3  ;;  %v2782_v47 = vand.u32 4294901760, %v1324_v35 }
  0xd4   : > { %2107 = vmatprep.subr.bf16.mxu0 %v2106_v12 }
  0xd5   : > { %v2785_v51 = vsub.f32 %v1324_v35, %v2782_v47 }
  0xd6   : > { %1072 = vmatmul.mubr.f32.gmra.mrb[2].mxu0 %v710_v14 }
  0xd7   : > { %2109 = vmatpush1.bf16.msra.mxu0 %v2108_v54  ;;  %1077 = vmatprep.mubr.f32.mxu0 %v2266_v3  ;;  %v1401_v2 = vand.u32 4294901760, %v2785_v51 }
  0xd8   : > { %2111 = vmatprep.subr.bf16.mxu0 %v2595_v17 }
  0xd9   : > { %v2795_v29 = vsub.f32 %v2785_v51, %v1401_v2 }
  0xda   : > { %1081 = vmatmul.mubr.f32.gmra.mrb[4].mxu0 %v721_v27 }
  0xdb   : > { %1086 = vmatprep.mubr.f32.mxu0 %v2266_v3 }
  0xde   : > { %1090 = vmatmul.mubr.f32.gmra.mrb[6].mxu0 %v732_v38 }
  0xdf   : > { %1184 = vmatprep.mubr.f32.mxu0 %v2266_v3 }
  0xe2   : > { %1186 = vmatmul.mubr.f32.vlgmr.msra.gmra.mrb[0].mxu0 %v2583_v61 }
  0xe3   : > { %2113 = vmatpush1.bf16.msra.mxu0 %v2599_v20  ;;  %1191 = vmatprep.mubr.f32.mxu0 %v2266_v3 }
  0xe4   : > { %2115 = vmatprep.subr.bf16.mxu0 %v2657_v58 }
  0xe6   : > { %1193 = vmatmul.mubr.f32.gmra.mrb[2].mxu0 %v2645_v9 }
  0xe7   : > { %2117 = vmatpush1.bf16.msra.mxu0 %v2661_v60  ;;  %1198 = vmatprep.mubr.f32.mxu0 %v2266_v3  ;;  %v604_v60 = vpop.permute.xlu1 %603 }
  0xea   : > { %1200 = vmatmul.mubr.f32.gmra.mrb[4].mxu0 %v2654_v56 }
  0xeb   : > { %1205 = vmatprep.mubr.f32.mxu0 %v2266_v3 }
  0xee   : > { %1207 = vmatmul.mubr.f32.gmra.mrb[6].mxu0 %v2681_v22 }
  0xef   : > { %1285 = vmatprep.mubr.f32.mxu0 %v2266_v3 }
  0xf2   : > { %1287 = vmatmul.mubr.f32.vlgmr.msra.gmra.mrb[0].mxu0 %v2583_v61 }
  0xf3   : > { %1292 = vmatprep.mubr.f32.mxu0 %v2266_v3 }
  0xf6   : > { %1294 = vmatmul.mubr.f32.gmra.mrb[2].mxu0 %v2645_v9 }
  0xf7   : > { %1299 = vmatprep.mubr.f32.mxu0 %v2266_v3 }
  0xfa   : > { %1301 = vmatmul.mubr.f32.gmra.mrb[4].mxu0 %v2654_v56 }
  0xfb   : > { %1306 = vmatprep.mubr.f32.mxu0 %v2266_v3 }
  0xfe   : > { %1308 = vmatmul.mubr.f32.gmra.mrb[6].mxu0 %v2681_v22 }
 0x185   : > { %v703_v13 = vpop.f32.mrb[0].mxu1 }
 0x186   : > { %v705_v17 = vpop.f32.mrb[1].mxu1  ;;  %v704_v9 = vadd.f32 %v703_v13, %v594_v46 }
 0x187   : > { %v706_v49 = vadd.f32 %v705_v17, %v594_v46 }
 0x18b   : > { %v714_v6 = vpop.f32.mrb[2].mxu1 }
 0x18c   : > { %v716_v20 = vpop.f32.mrb[3].mxu1  ;;  %v715_v57 = vadd.f32 %v714_v6, %v599_v48 }
 0x18d   : > { %v717_v59 = vadd.f32 %v716_v20, %v599_v48 }
 0x197   : > { %v862_v21 = vpop.f32.mrb[4].mxu1 }
 0x198   : > { %v864_v25 = vpop.f32.mrb[5].mxu1  ;;  %v2178_v19 = vadd.f32 %v862_v21, %v604_v60 }
 0x199   : > { %v2180_v24 = vadd.f32 %v864_v25, %v604_v60 }
 0x19b   : > { %v869_v28 = vpop.f32.mrb[6].mxu1 }
 0x19c   : > { %v871_v61 = vpop.f32.mrb[7].mxu1  ;;  %v2182_v32 = vadd.f32 %v869_v28, %v609_v16 }
 0x19d   : > { %v2184_v0 = vadd.f32 %v871_v61, %v609_v16 }
 0x1c5   : > { %v1288_v50 = vpop.f32.mrb[0].mxu0 }
 0x1c6   : > { %v2171_v52 = vadd.f32 %v1288_v50, %v704_v9  ;;  %v1290_v55 = vpop.f32.mrb[1].mxu0 }
 0x1c7   : > { %v2173_v56 = vadd.f32 %v1290_v55, %v706_v49 }
 0x1c8   : > { %v1314_v58 = vmax.f32 %v2171_v52, 0.0 }
 0x1c9   : > { %v1315_v62 = vmax.f32 %v2173_v56, 0.0  ;;  %v1295_v63 = vpop.f32.mrb[2].mxu0 }
 0x1ca   : > { %v1328_v4 = vand.u32 4294901760, %v1314_v58  ;;  %v2175_v10 = vadd.f32 %v1295_v63, %v715_v57  ;;  %v1297_v11 = vpop.f32.mrb[3].mxu0 }
 0x1cb   : > { %v1326_v14 = vand.u32 4294901760, %v1315_v62  ;;  %v2177_v18 = vadd.f32 %v1297_v11, %v717_v59 }
 0x1cc   : > { %v2788_v22 = vsub.f32 %v1314_v58, %v1328_v4  ;;  %v1316_v23 = vmax.f32 %v2175_v10, 0.0 }
 0x1cd   : > { %v2790_v26 = vsub.f32 %v1315_v62, %v1326_v14  ;;  %v1317_v27 = vmax.f32 %v2177_v18, 0.0  ;;  %v1302_v15 = vpop.f32.mrb[4].mxu0 }
 0x1ce   : > { %v1418_v31 = vand.u32 4294901760, %v2788_v22  ;;  %v1332_v33 = vand.u32 4294901760, %v1316_v23  ;;  %v2179_v34 = vadd.f32 %v2178_v19, %v1302_v15  ;;  %v1304_v36 = vpop.f32.mrb[5].mxu0 }
 0x1cf   : > { %v1412_v5 = vand.u32 4294901760, %v2790_v26  ;;  %v1330_v37 = vand.u32 4294901760, %v1317_v27  ;;  %v2181_v38 = vadd.f32 %v2180_v24, %v1304_v36 }
 0x1d0   : > { %v1419_v39 = vsub.f32 %v2788_v22, %v1418_v31  ;;  %v2800_v40 = vpack.c.bf16 %v1332_v33, %v1328_v4  ;;  %v2802_v41 = vsub.f32 %v1316_v23, %v1332_v33  ;;  %v1318_v42 = vmax.f32 %v2179_v34, 0.0 }
 0x1d1   : > { %v2804_v43 = vsub.f32 %v1317_v27, %v1330_v37  ;;  %v1319_v44 = vmax.f32 %v2181_v38, 0.0  ;;  %v1309_v45 = vpop.f32.mrb[6].mxu0  ;;  %v2806_v53 = vpack.c.bf16 %v1330_v37, %v1326_v14  ;;  %v1413_v12 = vsub.f32 %v2790_v26, %v1412_v5 }
 0x1d2   : > { %v1420_v54 = vand.u32 4294901760, %v1419_v39  ;;  %v1430_v13 = vand.u32 4294901760, %v2802_v41  ;;  %v1336_v17 = vand.u32 4294901760, %v1318_v42  ;;  %v2183_v6 = vadd.f32 %v2182_v32, %v1309_v45  ;;  %v1311_v20 = vpop.f32.mrb[7].mxu0  ;;  %v1878_v45 = vpop.permute.xlu1 %1877 }
 0x1d3   : > { %v1424_v21 = vand.u32 4294901760, %v2804_v43  ;;  %v1334_v25 = vand.u32 4294901760, %v1319_v44  ;;  %v2185_v28 = vadd.f32 %v2184_v0, %v1311_v20  ;;  %2119 = vmatprep.subr.bf16.mxu1 %v2806_v53  ;;  %v1414_v61 = vand.u32 4294901760, %v1413_v12 }
 0x1d4   : > { %v1431_v30 = vsub.f32 %v2802_v41, %v1430_v13  ;;  %v1441_v35 = vsub.f32 %v1318_v42, %v1336_v17  ;;  %v1320_v46 = vmax.f32 %v2183_v6, 0.0  ;;  %2121 = vmatpush1.bf16.msra.mxu1 %v2800_v40  ;;  %v2134_v48 = vpack.c.bf16 %v2804_v43, %v2790_v26 }
 0x1d5   : > { %v1435_v9 = vsub.f32 %v1319_v44, %v1334_v25  ;;  %v1321_v49 = vmax.f32 %v2185_v28, 0.0  ;;  %v1425_v50 = vsub.f32 %v2804_v43, %v1424_v21  ;;  %v2136_v52 = vpack.c.bf16 %v2802_v41, %v2788_v22 }
 0x1d6   : > { %v1432_v55 = vand.u32 4294901760, %v1431_v30  ;;  %v1442_v56 = vand.u32 4294901760, %v1441_v35  ;;  %v1340_v57 = vand.u32 4294901760, %v1320_v46  ;;  %v2150_v58 = vpack.c.bf16 %v1424_v21, %v1412_v5 }
 0x1d7   : > { %v1436_v59 = vand.u32 4294901760, %v1435_v9  ;;  %v1338_v60 = vand.u32 4294901760, %v1321_v49  ;;  %v1426_v62 = vand.u32 4294901760, %v1425_v50  ;;  %v2152_v63 = vpack.c.bf16 %v1430_v13, %v1418_v31 }
 0x1d8   : > { %v2124_v4 = vpack.c.bf16 %v1340_v57, %v1336_v17  ;;  %v1453_v10 = vsub.f32 %v1320_v46, %v1340_v57  ;;  %v2128_v11 = vpack.c.bf16 %v1432_v55, %v1420_v54  ;;  %v1443_v19 = vsub.f32 %v1441_v35, %v1442_v56 }
 0x1d9   : > { %v1447_v14 = vsub.f32 %v1321_v49, %v1338_v60  ;;  %v2122_v16 = vpack.c.bf16 %v1338_v60, %v1334_v25  ;;  %v2126_v18 = vpack.c.bf16 %v1426_v62, %v1414_v61  ;;  %v1403_v22 = vand.u32 4294901760, %v2795_v29 }
 0x1da   : > { %v1454_v23 = vand.u32 4294901760, %v1453_v10  ;;  %v2140_v24 = vpack.c.bf16 %v1453_v10, %v1441_v35  ;;  %v1437_v27 = vsub.f32 %v1435_v9, %v1436_v59  ;;  %v1444_v36 = vand.u32 4294901760, %v1443_v19 }
 0x1db   : > { %v1448_v26 = vand.u32 4294901760, %v1447_v14  ;;  %2123 = vmatprep.subr.bf16.mxu1 %v2122_v16  ;;  %v2138_v15 = vpack.c.bf16 %v1447_v14, %v1435_v9  ;;  %v2270_v29 = vmov 839922192  }
 0x1dc   : > { %v1455_v32 = vsub.f32 %v1453_v10, %v1454_v23  ;;  %2125 = vmatpush1.bf16.msra.mxu1 %v2124_v4  ;;  %v2156_v33 = vpack.c.bf16 %v1454_v23, %v1442_v56  ;;  %v1438_v0 = vand.u32 4294901760, %v1437_v27  ;;  %v1985_v10 = vpop.permute.xlu1 %1984 }
 0x1dd   : > { %2127 = vmatprep.subr.bf16.mxu1 %v2126_v18  ;;  %v1449_v31 = vsub.f32 %v1447_v14, %v1448_v26  ;;  %v2154_v34 = vpack.c.bf16 %v1448_v26, %v1436_v59 }
 0x1de   : > { %v1456_v5 = vand.u32 4294901760, %v1455_v32 }
 0x1df   : > { %1404 = vmatmul.mubr.f32.vlgmr.msra.gmra.mrb[8].mxu1 %v1403_v22  ;;  %v1450_v37 = vand.u32 4294901760, %v1449_v31 }
 0x1e0   : > { %2129 = vmatpush1.bf16.msra.mxu1 %v2128_v11  ;;  %v2132_v38 = vpack.c.bf16 %v1456_v5, %v1444_v36  ;;  %1514 = vmatprep.mubr.f32.mxu1 %v2266_v3 }
 0x1e1   : > { %v2130_v39 = vpack.c.bf16 %v1450_v37, %v1438_v0 }
 0x1e3   : > { %2131 = vmatprep.subr.bf16.mxu1 %v2130_v39 }
 0x1e4   : > { %2133 = vmatpush1.bf16.msra.mxu1 %v2132_v38 }
 0x1e5   : > { %2135 = vmatprep.subr.bf16.mxu1 %v2134_v48 }
 0x1e7   : > { %1516 = vmatmul.mubr.f32.vlgmr.msra.gmra.mrb[8].mxu1 %v2782_v47 }
 0x1e8   : > { %2137 = vmatpush1.bf16.msra.mxu1 %v2136_v52  ;;  %1602 = vmatprep.mubr.f32.mxu1 %v2266_v3 }
 0x1e9   : > { %2139 = vmatprep.subr.bf16.mxu1 %v2138_v15 }
 0x1ec   : > { %2141 = vmatpush1.bf16.msra.mxu1 %v2140_v24 }
 0x1ed   : > { %2143 = vmatprep.subr.bf16.mxu1 %v2806_v53 }
 0x1ef   : > { %1605 = vmatmul.mubr.f32.vlgmr.msra.gmra.mrb[8].mxu1 %v2785_v51  ;;  %v1880_v51 = vunpack.c.l.s4 %v2270_v29 }
 0x1f0   : > { %2145 = vmatpush1.bf16.msra.mxu1 %v2800_v40  ;;  %1683 = vmatprep.mubr.f32.mxu1 %v2266_v3 }
 0x1f1   : > { %2147 = vmatprep.subr.bf16.mxu1 %v2122_v16 }
 0x1f4   : > { %2149 = vmatpush1.bf16.msra.mxu1 %v2124_v4 }
 0x1f5   : > { %2151 = vmatprep.subr.bf16.mxu1 %v2150_v58 }
 0x1f7   : > { %1687 = vmatmul.mubr.f32.vlgmr.msra.gmra.mrb[8].mxu1 %v1401_v2  ;;  %v1881_v2 = vunpack.c.0.s8 %v1880_v51 }
 0x1f8   : > { %2153 = vmatpush1.bf16.msra.mxu1 %v2152_v63  ;;  %1781 = vmatprep.mubr.f32.mxu1 %v2266_v3  ;;  %v1971_v63 = vpop.permute.xlu0 %1970 }
 0x1f9   : > { %2155 = vmatprep.subr.bf16.mxu1 %v2154_v34  ;;  %v1884_v41 = vsub.s32 %v1881_v2, %v2366_v7 }
 0x1fb   : > { %v1978_v11 = vrot.slane %v1971_v63, %v1884_v41 }
 0x1fc   : > { %2157 = vmatpush1.bf16.msra.mxu1 %v2156_v33 }
 0x1fd   : > { %2159 = vmatprep.subr.bf16.mxu1 %v2806_v53  ;;  %v1885_v53 = vrot.slane %v1878_v45, %v1884_v41 }
 0x1ff   : > { %1783 = vmatmul.mubr.f32.vlgmr.msra.gmra.mrb[8].mxu1 %v2782_v47 }
 0x200   : > { %2161 = vmatpush1.bf16.msra.mxu1 %v2800_v40  ;;  %1861 = vmatprep.mubr.f32.mxu1 %v2266_v3 }
 0x201   : > { %2163 = vmatprep.subr.bf16.mxu1 %v2122_v16  ;;  %v1992_v16 = vrot.slane %v1985_v10, %v1884_v41 }
 0x204   : > { %2165 = vmatpush1.bf16.msra.mxu1 %v2124_v4 }
 0x207   : > { %1863 = vmatmul.mubr.f32.vlgmr.msra.gmra.mrb[8].mxu1 %v2782_v47  ;;  %v1909_v47 = vsub.s32 4, %v2366_v7 }
 0x2da   : > { %v1864_v42 = vpop.f32.mrb[8].mxu1 }
 0x2db   : > { %v1866_v43 = vpop.f32.mrb[9].mxu1 }
 0x2dc   : > { %v1871_v44 = vcombine.low %v1864_v42, %v1866_v43 }
 0x2de   : > { %v1873_v12 = vadd.f32 %v1871_v44, %v2339_v1 }
 0x2e0   : > { %v1887_v54 = vadd.f32 %v1885_v53, %v1873_v12 }
 0x2e2   : > { %v2060_v40 = vrot.slane %v1887_v54, 9  ;;  %v2061_v3 = vrot.slane %v1887_v54, 10  ;;  %v2062_v6 = vrot.slane %v1887_v54, 11 }
 0x2e4   : > { %v1892_v13 = vadd.f32 %v2060_v40, %v1887_v54 }
 0x2e6   : > { %v1896_v17 = vadd.f32 %v2061_v3, %v1892_v13 }
 0x2e8   : > { %v1900_v20 = vadd.f32 %v2062_v6, %v1896_v17 }
 0x2ea   : > { %v1901_v21 = vmul.f32 0.25, %v1900_v20 }
 0x2ec   : > { %v1906_v25 = vrot.slane %v1901_v21, %v2372_v8  ;;  %v1910_v28 = vrot.slane %v1901_v21, %v1909_v47 }
 0x2ee   : > { %v1916_v61 = vrot.slane %v1906_v25, %v2372_v8  ;;  %v1920_v30 = vrot.slane %v1910_v28, %v2372_v8 }
 0x2f0   : > { %v1923_v35 = vcombine.low %v1916_v61, %v1920_v30 }
 0x2f2   : > { %v1925_v46 = vsub.f32 %v1887_v54, %v1923_v35 }
 0x2f4   : > { %v1926_v1 = vmul.f32 %v1925_v46, %v1925_v46 }
 0x2f6   : > { %v2063_v48 = vrot.slane %v1926_v1, 9  ;;  %v2064_v49 = vrot.slane %v1926_v1, 10  ;;  %v2065_v52 = vrot.slane %v1926_v1, 11 }
 0x2f8   : > { %v1931_v9 = vadd.f32 %v2063_v48, %v1926_v1 }
 0x2fa   : > { %v1935_v50 = vadd.f32 %v2064_v49, %v1931_v9 }
 0x2fc   : > { %v1939_v55 = vadd.f32 %v2065_v52, %v1935_v50 }
 0x2fe   : > { %v1940_v56 = vmul.f32 0.25, %v1939_v55 }
 0x300   : > { %v1941_v7 = vadd.f32 1e-05, %v1940_v56 }
 0x302   : > { %2250 = vrsqrt.f32 %v1941_v7 }
 0x30c   : > { %v2251_v57 = vpop.eup %2250 }
 0x30d   : > { %v1947_v58 = vrot.slane %v2251_v57, %v2372_v8  ;;  %v1951_v59 = vrot.slane %v2251_v57, %v1909_v47 }
 0x30f   : > { %v1957_v60 = vrot.slane %v1947_v58, %v2372_v8  ;;  %v1961_v62 = vrot.slane %v1951_v59, %v2372_v8 }
 0x311   : > { %v1964_v4 = vcombine.low %v1957_v60, %v1961_v62 }
 0x313   : > { %v1966_v14 = vmul.f32 %v1964_v4, %v1925_v46 }
 0x315   : > { %v1980_v18 = vmul.f32 %v1978_v11, %v1966_v14 }
 0x317   : > { %v1994_v19 = vadd.f32 %v1992_v16, %v1980_v18 }
 0x319   : > { %1995 = vst [vmem:[%s332_s17] sm:$0xff] %v1994_v19 }
 0x31a PF: > { %s19_s30 = sadd.s32 1, %s2258_s30  }
 0x31b   : > { %p16_p4 = scmp.ge.s32.totalorder %s19_s30, 4  }
 0x31d   :  { %18 = sbr.rel (!%p16_p4) target bundleno = 1 (0x1), region = 86 }

</bundles_post_ra>
